<compile_context>
chip_gen: v7x
topology: tpu7x:2x2x1
jax: 0.10.0
libtpu: 0.0.40
codegen_flags: <defaults>
</compile_context>

<pallas_src>
import numpy as np
import jax
import jax.numpy as jnp
from jax.experimental import pallas as pl
from jax.experimental.pallas import tpu as pltpu


# ---------------------------------------------------------------------------
# Mask generation (deterministic stand-in for masksembles.common.generate_masks)
# ---------------------------------------------------------------------------
def generate_masks_deterministic(channels: int, n: int, scale: float) -> np.ndarray:
    # TODO(synk): the original generate_masks uses an iterative random search for
    # mask width/overlap; here we use a deterministic structured pattern with the
    # same binary-mask semantics (n masks of width `channels`, ~channels/scale on).
    num_active = max(1, int(round(channels / scale)))
    masks = np.zeros((n, channels), dtype=np.float32)
    for i in range(n):
        idx = (np.arange(num_active) * scale + i).astype(np.int64) % channels
        masks[i, idx] = 1.0
    return masks


# ---------------------------------------------------------------------------
# Kernel: out = f32(x) * mask   (mask broadcasts over group rows & spatial lanes)
# ---------------------------------------------------------------------------
def _masksembles_kernel(x_ref, m_ref, o_ref):
    o_ref[...] = x_ref[...].astype(jnp.float32) * m_ref[...]


def _round_down(v: int, m: int) -> int:
    return (v // m) * m


def _block_budget():
    """Returns (max_block_elems, vmem_limit_bytes), generation-aware when queryable."""
    try:
        info = pltpu.get_tpu_info()
        if info.vmem_capacity_bytes <= 64 * 1024 * 1024:
            # v7x-class: 3.2 TB/s HBM but 64 MiB physical VMEM -> ~4 MiB f32 output
            # blocks amortize the ~0.35 us per-step overhead; double-buffered
            # in+out of that size still leaves >=16 MiB headroom at a 40 MiB limit.
            return 1024 * 1024, 40 * 1024 * 1024
    except Exception:
        pass
    # v5e / v6e (128 MiB VMEM): 2 MiB f32 blocks already hit ~85% of HBM roofline.
    return 512 * 1024, 32 * 1024 * 1024


def _pick_tiles_4d(g: int, C: int, HW: int, budget: int):
    """Tiles for the (n, g, C, HW) layout; last block dim full or a multiple of 128."""
    per_sample = max(1, budget // C)
    hw_t = HW if HW <= per_sample else max(128, _round_down(per_sample, 128))
    g_t = min(g, max(1, budget // (C * hw_t)))
    return g_t, hw_t


def _pick_tiles_flat(g: int, CHW: int, budget: int):
    """Tiles for the (n, g, C*HW) layout; group tile must be full-extent or 8-aligned."""
    if g <= 8:
        g_t = g
    else:
        rows = budget // max(1, CHW)
        if rows >= g:
            g_t = g
        elif rows >= 8:
            g_t = _round_down(rows, 8)
        else:
            g_t = 8
    per_row = max(1, budget // g_t)
    l_t = CHW if CHW <= per_row else max(128, _round_down(per_row, 128))
    return g_t, l_t


def masksembles2d_forward(x: jax.Array, masks: jax.Array) -> jax.Array:
    """x: (N, C, H, W); masks: (n, C) binary. Returns (N, C, H, W) float32."""
    N, C, H, W = x.shape
    n, mask_width = masks.shape
    assert mask_width == C, "mask width must equal the channel count"
    assert N % n == 0, "batch must be divisible by the number of masks"
    g = N // n  # samples per mask group
    HW = H * W

    max_block_elems, vmem_limit = _block_budget()
    masks_f32 = masks.astype(jnp.float32)

    out_bytes = N * C * HW * 4
    cost = pl.CostEstimate(
        flops=N * C * HW,
        transcendentals=0,
        bytes_accessed=x.size * x.dtype.itemsize + out_bytes + masks.size * 4,
    )
    cparams = pltpu.CompilerParams(
        dimension_semantics=("parallel", "parallel", "parallel"),
        vmem_limit_bytes=vmem_limit,
    )

    if HW >= 128 and HW % 128 == 0:
        # Lane-dense HW tiles; per-group mask row stays resident across i/j.
        g_t, hw_t = _pick_tiles_4d(g, C, HW, max_block_elems)
        x4 = x.reshape(n, g, C, HW)                 # free, contiguous
        m4 = masks_f32.reshape(n, 1, C, 1)
        grid = (n, pl.cdiv(g, g_t), pl.cdiv(HW, hw_t))
        out = pl.pallas_call(
            _masksembles_kernel,
            out_shape=jax.ShapeDtypeStruct((n, g, C, HW), jnp.float32),
            grid=grid,
            in_specs=[
                pl.BlockSpec((1, g_t, C, hw_t), lambda k, i, j: (k, i, 0, j)),
                pl.BlockSpec((1, 1, C, 1), lambda k, i, j: (k, 0, 0, 0)),
            ],
            out_specs=pl.BlockSpec((1, g_t, C, hw_t), lambda k, i, j: (k, i, 0, j)),
            compiler_params=cparams,
            cost_estimate=cost,
        )(x4, m4)
    else:
        # Small / non-128-aligned feature maps: flatten (C, HW) onto the lane axis
        # so stores are (mostly) unmasked; mask pre-expanded to (n, 1, C*HW)
        # (n*C*HW*4 bytes, negligible vs streaming x for g > 1).
        CHW = C * HW
        g_t, l_t = _pick_tiles_flat(g, CHW, max_block_elems)
        x3 = x.reshape(n, g, CHW)
        m3 = jnp.repeat(masks_f32, HW, axis=1).reshape(n, 1, CHW)
        grid = (n, pl.cdiv(g, g_t), pl.cdiv(CHW, l_t))
        out = pl.pallas_call(
            _masksembles_kernel,
            out_shape=jax.ShapeDtypeStruct((n, g, CHW), jnp.float32),
            grid=grid,
            in_specs=[
                pl.BlockSpec((1, g_t, l_t), lambda k, i, j: (k, i, j)),
                pl.BlockSpec((1, 1, l_t), lambda k, i, j: (k, 0, j)),
            ],
            out_specs=pl.BlockSpec((1, g_t, l_t), lambda k, i, j: (k, i, j)),
            compiler_params=cparams,
            cost_estimate=cost,
        )(x3, m3)

    return out.reshape(N, C, H, W)


def masksembles2d_reference(x: jax.Array, masks: jax.Array) -> jax.Array:
    N = x.shape[0]
    n = masks.shape[0]
    g = N // n
    per_sample_mask = masks[jnp.arange(N) // g]  # (N, C)
    return (x.astype(jnp.float32)
            * per_sample_mask.astype(jnp.float32)[:, :, None, None])


if __name__ == "__main__":
    # Module config: channels=16, n=4, scale=2.0 ; batch divisible by n.
    channels, n, scale = 16, 4, 2.0
    masks = jnp.asarray(generate_masks_deterministic(channels, n, scale))  # (n, C)

    key = jax.random.PRNGKey(0)
    k1, k2 = jax.random.split(key)

    # Test 1: 128-aligned HW path (f32 input).
    N, C, H, W = 8, channels, 16, 16
    x = jax.random.normal(k1, (N, C, H, W), dtype=jnp.float32)
    out = jax.block_until_ready(masksembles2d_forward(x, masks))
    ref = masksembles2d_reference(x, masks)
    assert out.shape == (N, C, H, W) and out.dtype == jnp.float32
    np.testing.assert_allclose(np.asarray(out), np.asarray(ref), rtol=0, atol=0)

    # Test 2: small non-128-aligned HW path (bf16 input, fused f32 cast).
    N2, H2, W2 = 8, 7, 7
    x2 = jax.random.normal(k2, (N2, channels, H2, W2), dtype=jnp.bfloat16)
    out2 = jax.block_until_ready(masksembles2d_forward(x2, masks))
    ref2 = masksembles2d_reference(x2, masks)
    assert out2.shape == (N2, channels, H2, W2) and out2.dtype == jnp.float32
    np.testing.assert_allclose(np.asarray(out2), np.asarray(ref2), rtol=0, atol=0)

    print("KERNEL_OK")
</pallas_src>

<mosaic_0001>
module attributes {stable_mosaic.version = 11 : i64} {
  func.func @_masksembles_kernel(%arg0: i32, %arg1: i32, %arg2: i32, %arg3: memref<1x2x16x256xf32, #tpu.memory_space<vmem>>, %arg4: memref<1x1x16x1xf32, #tpu.memory_space<vmem>>, %arg5: memref<1x2x16x256xf32, #tpu.memory_space<vmem>>) attributes {dimension_semantics = [#tpu.dimension_semantics<parallel>, #tpu.dimension_semantics<parallel>, #tpu.dimension_semantics<parallel>], iteration_bounds = array<i64: 4, 1, 1>, scalar_prefetch = 0 : i64, scratch_operands = 0 : i64, tpu.core_type = #tpu.core_type<tc>, window_params = [{transform_indices = @transform_0, window_bounds = array<i64: 1, 2, 16, 256>}, {transform_indices = @transform_1, window_bounds = array<i64: 1, 1, 16, 1>}, {transform_indices = @transform_2, window_bounds = array<i64: 1, 2, 16, 256>}]} {
    %c0 = arith.constant 0 : index
    %c0_0 = arith.constant 0 : index
    %c0_1 = arith.constant 0 : index
    %c0_2 = arith.constant 0 : index
    %0 = vector.load %arg3[%c0, %c0_0, %c0_1, %c0_2] : memref<1x2x16x256xf32, #tpu.memory_space<vmem>>, vector<1x2x16x256xf32>
    %c0_3 = arith.constant 0 : index
    %c0_4 = arith.constant 0 : index
    %c0_5 = arith.constant 0 : index
    %c0_6 = arith.constant 0 : index
    %1 = vector.load %arg4[%c0_3, %c0_4, %c0_5, %c0_6] : memref<1x1x16x1xf32, #tpu.memory_space<vmem>>, vector<1x1x16x1xf32>
    %2 = vector.broadcast %1 : vector<1x1x16x1xf32> to vector<1x2x16x256xf32>
    %3 = arith.mulf %0, %2 : vector<1x2x16x256xf32>
    %c0_7 = arith.constant 0 : index
    %c0_8 = arith.constant 0 : index
    %c0_9 = arith.constant 0 : index
    %c0_10 = arith.constant 0 : index
    %4 = vector.load %arg5[%c0_7, %c0_8, %c0_9, %c0_10] : memref<1x2x16x256xf32, #tpu.memory_space<vmem>>, vector<1x2x16x256xf32>
    tpu.vector_store %arg5[%c0_7, %c0_8, %c0_9, %c0_10], %3 {strides = array<i32>} : memref<1x2x16x256xf32, #tpu.memory_space<vmem>>, vector<1x2x16x256xf32>,
    return
  }
  func.func @transform_0(%arg0: i32, %arg1: i32, %arg2: i32) -> (i32, i32, i32, i32) {
    %c0_i32 = arith.constant 0 : i32
    %c0_i32_0 = arith.constant 0 : i32
    return %arg0, %arg1, %c0_i32, %arg2 : i32, i32, i32, i32
  }
  func.func @transform_1(%arg0: i32, %arg1: i32, %arg2: i32) -> (i32, i32, i32, i32) {
    %c0_i32 = arith.constant 0 : i32
    %c0_i32_0 = arith.constant 0 : i32
    %c0_i32_1 = arith.constant 0 : i32
    %c0_i32_2 = arith.constant 0 : i32
    return %arg0, %c0_i32, %c0_i32_0, %c0_i32_1 : i32, i32, i32, i32
  }
  func.func @transform_2(%arg0: i32, %arg1: i32, %arg2: i32) -> (i32, i32, i32, i32) {
    %c0_i32 = arith.constant 0 : i32
    %c0_i32_0 = arith.constant 0 : i32
    return %arg0, %arg1, %c0_i32, %arg2 : i32, i32, i32, i32
  }
}

</mosaic_0001>

<bundles_post_ra>
// kernel: tpu_custom_call.1
= control target key start
LH: loop header
LB: loop body
LE: loop exit
PB: predicated region body
PF: predicated region fallthrough
CT: control target
= control target key end

     0   :  { %7 = vsyncpa [#allocation3], 0  ;;  %s781_s0 = inlined_call_operand.hbm [shape: f32[4,2,16,256], index: 0, kind: input, shape index: {}]   ;;  %s782_s1 = inlined_call_operand.vmem [shape: f32[4,1,16,1], index: 1, kind: input, shape index: {}]   ;;  %s783_s2 = inlined_call_operand.hbm [shape: f32[4,2,16,256], index: 2, kind: output, shape index: {}]  }
   0x1   :  { %9 = vsyncpa [#allocation3 + $0x1], 0 }
   0x2   :  { %10 = vsyncpa [#allocation4], 0 }
   0x3   :  { %12 = vsyncpa [#allocation4 + $0x1], 0  ;;  %s603_s9 = smov 0   ;;  %s605_s10 = smov 0  }
   0x4   :  { %s607_s11 = smov 0   ;;  %s609_s12 = smov 0  }
   0x5   :  { %s611_s13 = smov 0   ;;  %s613_s14 = smov 0  }
   0x6 LB: > { %s379_s15 = sadd.s32 4294967295, %s579_s14   ;;  %s380_s16 = sadd.s32 4294967294, %s579_s14   ;;  %s579_s14 = sphi %s613_s14, %s18_s14   ;;  %s575_s13 = sphi %s611_s13, %s797_s13   ;;  %s571_s12 = sphi %s609_s12, %s796_s12   ;;  %s567_s11 = sphi %s607_s11, %s795_s11   ;;  %s563_s10 = sphi %s605_s10, %s794_s10   ;;  %s559_s9 = sphi %s603_s9, %s793_s9  }
   0x7   : > { %s37_s17 = sadd.s32 1, %s575_s13  ;;  %s48_s18 = sadd.s32 1, %s567_s11 }
   0x8   : > { %p39_p0 = scmp.ge.s32.totalorder %s37_s17, 4  ;;  %p55_p1 = scmp.ne.s32.totalorder %s567_s11, %s563_s10 }
   0x9   : > { %p56_p2 = scmp.eq.s32.totalorder %s579_s14, 0  ;;  %p61_p3 = scmp.ne.s32.totalorder %s563_s10, %s559_s9 }
   0xa   : > { %s799_s17 = smov (%p39_p0, %s37_s17), 0  ;;  %p62_p5 = scmp.eq.s32.totalorder %s379_s15, 0 }
   0xb   : > { %p644_p4 = por %p56_p2, %p55_p1  ;;  %s41_s20 = ssub.s32 %s575_s13, %s799_s17 }
   0xc   : > { %p115_p6 = scmp.eq.s32.totalorder %s379_s15, 3  ;;  %p46_p7 = scmp.eq.s32.totalorder %s41_s20, 0 }
   0xd   : > { %p650_p8 = por %p62_p5, %p61_p3  ;;  %p121_p10 = scmp.eq.s32.totalorder %s380_s16, 3 }
   0xe   : > { %p654_p9 = por %p115_p6, %p55_p1  ;;  %p411_p12 = scmp.lt.s32.totalorder %s579_s14, 4 }
   0xf   : > { %s659_s23 = scalar_select %p46_p7, %s567_s11, %s48_s18  }
  0x10   : > { %s787_s22 = scalar_select %p654_p9, 1, 0 }
  0x11   : > { %p661_p11 = por %p121_p10, %p61_p3  ;;  %s141_s25 = sand.u32 1, %s567_s11  }
  0x12   : > { %s383_s26 = sshll.u32 %s141_s25, 6  ;;  %s396_s27 = sshll.u32 %s575_s13, 10 }
  0x13   : > { %s788_s24 = scalar_select %p661_p11, 1, 0 }
  0x14   : > { %s671_s30 = scalar_lea.hbm %s781_s0, %s396_s27  ;;  %s145_s3 = scalar_lea.vmem [#allocation2], %s383_s26 }
  0x15   : > { %s157_s4 = sshll.u32 %s145_s3, 4  ;;  %p677_p13 = pnand %p411_p12, %p644_p4  ;;  %s673_s4 = int_to_ptr.vmem [resolvable:$true] %s157_s4 }
  0x16   : > { %s682_s6 = scalar_lea.sflag [#allocation3], %s141_s25  ;;  %s467_s7 = scalar_lea.hbm %s671_s30, 1024 }
  0x17   : > { %p468_p1 = scmp.ne.s32.totalorder %s671_s30, %s467_s7  ;;  %p469_p2 = pneg %p677_p13 }
  0x18   : > { %s472_s16 = scalar_lea.hbm %s781_s0, 4096  ;;  %p473_p4 = scmp.lt.u32.totalorder %s671_s30, %s781_s0 }
  0x19   : > { %p470_p3 = pnand %p469_p2, %p468_p1  ;;  %p474_p6 = scmp.lt.u32.totalorder %s472_s16, %s467_s7 }
  0x1a   : > { %p476_p10 = scmp.lt.u32.totalorder %s467_s7, %s671_s30 }
  0x1b   : > { %p471_p5 = pneg %p470_p3  ;;  %p475_p7 = por %p474_p6, %p473_p4 }
  0x1d   : > { %p477_p12 = por %p476_p10, %p475_p7 }
  0x1f   : > { %p478_p0 = pnand %p477_p12, %p471_p5 }
  0x21   : > { %481 = shalt.err (!%p478_p0)
}
  0x22   : > { %s482_s20 = scalar_lea.vmem %s673_s4, 1024  ;;  %s581_s25 = smov [#allocation2]  }
  0x23   : > { %p483_p1 = scmp.ne.s32.totalorder %s673_s4, %s482_s20  ;;  %s487_s26 = sshll.u32 %s581_s25, 4  ;;  %s488_s26 = int_to_ptr.vmem [resolvable:$false] %s487_s26 }
  0x24   : > { %s489_s27 = scalar_lea.vmem %s488_s26, 2048  ;;  %p490_p9 = scmp.lt.s32.totalorder %s673_s4, %s488_s26 }
  0x25   : > { %p485_p3 = pnand %p483_p1, %p469_p2  ;;  %p491_p4 = scmp.lt.s32.totalorder %s489_s27, %s482_s20 }
  0x27   : > { %p486_p11 = pneg %p485_p3  ;;  %p492_p6 = por %p491_p4, %p490_p9 }
  0x29   : > { %p493_p7 = pnand %p492_p6, %p486_p11 }
  0x2b   : > { %496 = shalt.err (!%p493_p7)
}
  0x2c   : > { %s582_s28 = smov 256   ;;  %s583_s29 = smov 16  }
  0x2d   : > { %406 = dma.hbm_to_vmem [thread:$0]  (!%p677_p13), %s671_s30, 1024, %s673_s4, %s682_s6, %s582_s28, %s582_s28, %s583_s29  }
  0x2e   : > { %p173_p0 = scmp.lt.s32.totalorder %s579_s14, 5  ;;  %p790_p2 = scmp.ge.s32.totalorder %s579_s14, 1 }
  0x30   : > { %p174_p5 = pnand %p790_p2, %p173_p0 }
  0x31   : > { %s714_s3 = sand.u32 (!%p174_p5), 1, %s563_s10  }
  0x32   : > { %177 = sbr.rel (%p174_p5) target bundleno = 215 (0xd7), region = 28  ;;  %s387_s7 = sshll.u32 (!%p174_p5), %s714_s3, 6 }
  0x33   : > { %s180_s8 = scalar_lea.sflag (!%p174_p5), [#allocation3], %s714_s3  ;;  %s183_s15 = scalar_lea.vmem (!%p174_p5), [#allocation2], %s387_s7 }
  0x39   : > { %550 = dma.done.wait (%p650_p8), %s180_s8, 1024  }
  0x3a   : > { %552 = vsyncadd (%p650_p8), %s180_s8, 4294966272  ;;  %p211_p9 = scmp.lt.s32.totalorder %s571_s12, 3  ;;  %v584_v0 = vmov 0   ;;  %v218_v3 = vld [vmem:[%s183_s15] sm:$0xff]  ;;  %v219_v4 = vld [vmem:[%s183_s15 + $0x8] sm:$0xff]  ;;  %s398_s21 = sshll.u32 %s571_s12, 10 }
  0x3b   : > { %466 = vset.pattern.permute.xlu0 %v584_v0  ;;  %v222_v5 = vld [vmem:[%s183_s15 + $0x20] sm:$0xff]  ;;  %v223_v6 = vld [vmem:[%s183_s15 + $0x28] sm:$0xff]  ;;  %v220_v12 = vld [vmem:[%s183_s15 + $0x10] sm:$0xff]  ;;  %s208_s18 = scalar_lea.vmem [#allocation5], %s387_s7  ;;  %s731_s26 = scalar_lea.hbm %s783_s2, %s398_s21 }
  0x3c   : > { %s212_s30 = scalar_select %p211_p9, %s571_s12, 3  ;;  %v221_v13 = vld [vmem:[%s183_s15 + $0x18] sm:$0xff]  ;;  %v224_v14 = vld [vmem:[%s183_s15 + $0x30] sm:$0xff] }
  0x3d   : > { %s273_s19 = sshll.u32 %s208_s18, 4  ;;  %v225_v15 = vld [vmem:[%s183_s15 + $0x38] sm:$0xff]  ;;  %s255_s12 = scalar_lea.sflag [#allocation4], %s714_s3  ;;  %s733_s19 = int_to_ptr.vmem [resolvable:$true] %s273_s19 }
  0x3e   : > { %s397_s4 = sshll.u32 %s212_s30, 4  ;;  %s497_s27 = scalar_lea.vmem %s733_s19, 1024 }
  0x3f   : > { %s215_s16 = scalar_lea.vmem %s782_s1, %s397_s4  ;;  %p498_p8 = scmp.ne.s32.totalorder %s733_s19, %s497_s27 }
  0x40   : > { %v226_v1 = vld [vmem:[%s215_s16] sm:$0xff]  ;;  %v227_v2 = vld [vmem:[%s215_s16 + $0x8] sm:$0xff]  ;;  %p791_p11 = scmp.ne.s32.totalorder %s787_s22, 0  ;;  %s585_s28 = smov [#allocation5]  }
  0x41   : > { %230 = vperm.xlu0 %466, %v226_v1   ;;  %s501_s29 = sshll.u32 %s585_s28, 4  ;;  %s502_s29 = int_to_ptr.vmem [resolvable:$false] %s501_s29 }
  0x42   : > { %p499_p13 = pnand %p498_p8, %p791_p11  ;;  %s503_s7 = scalar_lea.vmem %s502_s29, 2048 }
  0x43   : > { %p504_p12 = scmp.lt.s32.totalorder %s733_s19, %s502_s29  ;;  %p505_p1 = scmp.lt.s32.totalorder %s503_s7, %s497_s27 }
  0x44   : > { %p500_p10 = pneg %p499_p13 }
  0x45   : > { %235 = vperm.xlu0 %466, %v227_v2   ;;  %p506_p3 = por %p505_p1, %p504_p12 }
  0x47   : > { %p507_p4 = pnand %p506_p3, %p500_p10 }
  0xc0   : > { %v231_v7 = vpop.permute.xlu0 %230 }
  0xc1   : > { %v238_v8 = vmul.f32 %v231_v7, %v218_v3  ;;  %v239_v9 = vmul.f32 %v231_v7, %v219_v4  ;;  %v242_v10 = vmul.f32 %v231_v7, %v222_v5  ;;  %v243_v11 = vmul.f32 %v231_v7, %v223_v6 }
  0xc3   : > { %246 = vst [vmem:[%s208_s18] sm:$0xff] %v238_v8  ;;  %247 = vst [vmem:[%s208_s18 + $0x8] sm:$0xff] %v239_v9 }
  0xc4   : > { %250 = vst [vmem:[%s208_s18 + $0x20] sm:$0xff] %v242_v10  ;;  %251 = vst [vmem:[%s208_s18 + $0x28] sm:$0xff] %v243_v11  ;;  %v236_v16 = vpop.permute.xlu0 %235 }
  0xc5   : > { %v240_v17 = vmul.f32 %v236_v16, %v220_v12  ;;  %v241_v18 = vmul.f32 %v236_v16, %v221_v13  ;;  %v244_v19 = vmul.f32 %v236_v16, %v224_v14  ;;  %v245_v20 = vmul.f32 %v236_v16, %v225_v15 }
  0xc7   : > { %248 = vst [vmem:[%s208_s18 + $0x10] sm:$0xff] %v240_v17  ;;  %249 = vst [vmem:[%s208_s18 + $0x18] sm:$0xff] %v241_v18 }
  0xc8   : > { %252 = vst [vmem:[%s208_s18 + $0x30] sm:$0xff] %v244_v19  ;;  %253 = vst [vmem:[%s208_s18 + $0x38] sm:$0xff] %v245_v20 }
  0xc9   : > { %510 = shalt.err (!%p507_p4)
}
  0xca   : > { %s511_s8 = scalar_lea.hbm %s731_s26, 1024  ;;  %s515_s4 = scalar_lea.hbm %s783_s2, 4096 }
  0xcb   : > { %p512_p6 = scmp.ne.s32.totalorder %s731_s26, %s511_s8  ;;  %p516_p2 = scmp.lt.u32.totalorder %s731_s26, %s783_s2 }
  0xcc   : > { %p517_p5 = scmp.lt.u32.totalorder %s515_s4, %s511_s8  ;;  %p519_p8 = scmp.lt.u32.totalorder %s511_s8, %s731_s26 }
  0xcd   : > { %p513_p7 = pnand %p512_p6, %p791_p11 }
  0xce   : > { %p518_p9 = por %p517_p5, %p516_p2 }
  0xcf   : > { %p514_p0 = pneg %p513_p7 }
  0xd0   : > { %p520_p13 = por %p519_p8, %p518_p9 }
  0xd2   : > { %p521_p10 = pnand %p520_p13, %p514_p0 }
  0xd4   : > { %524 = shalt.err (!%p521_p10)
}
  0xd5   : > { %s586_s16 = smov 256   ;;  %s587_s21 = smov 16  }
  0xd6   : > { %401 = dma.vmem_to_hbm [thread:$0]  (%p791_p11), %s733_s19, 1024, %s731_s26, %s255_s12, %s586_s16, %s586_s16, %s587_s21  }
  0xd7 PF: > { %p412_p12 = scmp.ge.s32.totalorder %s579_s14, 2  ;;  %s288_s18 = sand.u32 1, %s559_s9  }
  0xd8   : > { %p792_p1 = scmp.ne.s32.totalorder %s788_s24, 0  ;;  %s289_s20 = scalar_lea.sflag [#allocation4], %s288_s18 }
  0xda   : > { %p408_p3 = pnand %p412_p12, %p792_p1 }
  0xdc   : > { %554 = dma.done.wait (!%p408_p3), %s289_s20, 1024  }
  0xdd   : > { %556 = vsyncadd (!%p408_p3), %s289_s20, 4294966272  ;;  %s18_s14 = sadd.s32 1, %s579_s14   ;;  %s793_s9 = smov %s563_s10 }
  0xde   : > { %p15_p4 = scmp.ge.s32.totalorder %s18_s14, 6   ;;  %s794_s10 = smov %s567_s11 }
  0xdf   : > { %s795_s11 = smov %s659_s23  ;;  %s796_s12 = smov %s575_s13 }
  0xe0   : > { %s797_s13 = smov %s799_s17  ;;  %17 = sbr.rel (!%p15_p4) target bundleno = 6 (0x6), region = 76 }
  0xe7   :  { %294 = vsyncpa [#allocation3], 1 }
  0xe8   :  { %296 = vsyncpa [#allocation3 + $0x1], 1 }
  0xe9   :  { %297 = vsyncpa [#allocation4], 1 }
  0xea   :  { %299 = vsyncpa [#allocation4 + $0x1], 1 }

</bundles_post_ra>
